<compile_context>
chip_gen: v6e
topology: v6e:2x2x1
jax: 0.10.0
libtpu: 0.0.40
codegen_flags: <defaults>
</compile_context>

<pallas_src>
import jax
import jax.numpy as jnp
from jax.experimental import pallas as pl
from jax.experimental.pallas import tpu as pltpu


def _sine_kernel(x_ref, o_ref):
    x = x_ref[...]
    # NOTE: jnp.sin lowers to a VALU range-reduction polynomial (not EUP); the
    # trailing `* x` is effectively free filler in spare VALU slots.
    o_ref[...] = jnp.sin(x) * x


_LANE = 128
_WIDTH_CANDIDATES = (4096, 2048, 1024, 512, 256, 128)
# ~2 MiB/block: in+out x double-buffering = ~8 MiB VMEM, safe on every generation
# (v5e 16 MiB scoped default, v6e 32 MiB, v7x 32 MiB of 64 MiB physical).
_TARGET_BLOCK_BYTES = 2 * 1024 * 1024
# Above this size prefer >= 2 grid blocks so v7x's two TensorCores both get work.
_SPLIT_BYTES = 512 * 1024


def _sublane_unit(dtype) -> int:
    itemsize = jnp.dtype(dtype).itemsize
    # f32 -> 8, bf16/f16 -> 16, int8/fp8 -> 32 (packed sublane tiles).
    return max(8, 8 * (4 // max(1, itemsize)))


def sine_forward(x: jax.Array, *, target_block_bytes: int = _TARGET_BLOCK_BYTES) -> jax.Array:
    """Computes sin(x) * x elementwise via a Pallas TPU kernel."""
    orig_shape = x.shape
    dtype = x.dtype
    itemsize = jnp.dtype(dtype).itemsize
    n = x.size
    if n == 0:
        return x

    # Lane-pad only when strictly necessary (n % 128 != 0); otherwise the reshape
    # below is a free (no-copy) relayout.
    n_pad = pl.cdiv(n, _LANE) * _LANE
    flat = jnp.ravel(x)
    if n_pad != n:
        flat = jnp.pad(flat, (0, n_pad - n))

    # Widest lane-dense last dim that divides the (padded) element count.
    width = _LANE
    for w in _WIDTH_CANDIDATES:
        if n_pad % w == 0:
            width = w
            break
    rows = n_pad // width
    x2d = flat.reshape(rows, width)

    unit = _sublane_unit(dtype)
    # Tile height targeting ~target_block_bytes per block, rounded to the dtype's
    # sublane packing unit.
    tr = max(unit, (target_block_bytes // (width * itemsize)) // unit * unit)

    if tr >= rows:
        # Small / single-block path: whole slab as one block (full-extent block
        # shapes are always legal; avoids per-step pipeline overhead entirely).
        tr = rows
        grid_n = 1
        # Medium slabs: split into >= 2 blocks so both v7x TensorCores are used.
        if rows >= 2 * unit and rows * width * itemsize >= _SPLIT_BYTES:
            half = pl.cdiv(rows, 2)
            tr = pl.cdiv(half, unit) * unit
            grid_n = pl.cdiv(rows, tr)
    else:
        # Partial last block (if any) is masked by Pallas -- no host-side row pad.
        grid_n = pl.cdiv(rows, tr)

    cost = pl.CostEstimate(
        flops=2 * n,
        transcendentals=n,
        bytes_accessed=2 * n * itemsize,
    )

    out2d = pl.pallas_call(
        _sine_kernel,
        out_shape=jax.ShapeDtypeStruct((rows, width), dtype),
        grid_spec=pltpu.PrefetchScalarGridSpec(
            num_scalar_prefetch=0,
            grid=(grid_n,),
            in_specs=[pl.BlockSpec((tr, width), lambda i: (i, 0))],
            out_specs=pl.BlockSpec((tr, width), lambda i: (i, 0)),
        ),
        compiler_params=pltpu.CompilerParams(
            dimension_semantics=("parallel",),
        ),
        cost_estimate=cost,
    )(x2d)

    out = out2d.reshape(-1)
    if n_pad != n:
        out = out[:n]
    return out.reshape(orig_shape)


if __name__ == "__main__":
    key = jax.random.PRNGKey(0)
    k1, k2, k3 = jax.random.split(key, 3)

    # 1) Small NCHW input consistent with the image-representation module
    #    (exercises the single-block fast path; 2048 elements -> no padding).
    x_small = jax.random.normal(k1, (2, 4, 16, 16), dtype=jnp.float32)
    y_small = jax.block_until_ready(sine_forward(x_small))
    assert y_small.shape == x_small.shape and y_small.dtype == x_small.dtype
    assert jnp.allclose(y_small, jnp.sin(x_small) * x_small, atol=1e-5, rtol=1e-5)

    # 2) Larger input exercising the wide-slab, multi-block tiled path.
    x_big = jax.random.normal(k2, (4, 8, 64, 128), dtype=jnp.float32)
    y_big = jax.block_until_ready(sine_forward(x_big))
    assert jnp.allclose(y_big, jnp.sin(x_big) * x_big, atol=1e-5, rtol=1e-5)

    # 3) Awkward shape (element count not a multiple of 128) -> lane-pad path.
    x_odd = jax.random.normal(k3, (2, 3, 17, 19), dtype=jnp.float32)
    y_odd = jax.block_until_ready(sine_forward(x_odd))
    assert jnp.allclose(y_odd, jnp.sin(x_odd) * x_odd, atol=1e-5, rtol=1e-5)

    print("KERNEL_OK")
</pallas_src>

<mosaic_0001>
module attributes {stable_mosaic.version = 11 : i64} {
  func.func @_sine_kernel(%arg0: i32, %arg1: memref<1x2048xf32, #tpu.memory_space<vmem>>, %arg2: memref<1x2048xf32, #tpu.memory_space<vmem>>) attributes {dimension_semantics = [#tpu.dimension_semantics<parallel>], iteration_bounds = array<i64: 1>, scalar_prefetch = 0 : i64, scratch_operands = 0 : i64, tpu.core_type = #tpu.core_type<tc>, window_params = [{transform_indices = @transform_0, window_bounds = array<i64: 1, 2048>}, {transform_indices = @transform_1, window_bounds = array<i64: 1, 2048>}]} {
    %c0 = arith.constant 0 : index
    %c0_0 = arith.constant 0 : index
    %0 = vector.load %arg1[%c0, %c0_0] : memref<1x2048xf32, #tpu.memory_space<vmem>>, vector<1x2048xf32>
    %1 = math.sin %0 : vector<1x2048xf32>
    %2 = arith.mulf %1, %0 : vector<1x2048xf32>
    %c0_1 = arith.constant 0 : index
    %c0_2 = arith.constant 0 : index
    %3 = vector.load %arg2[%c0_1, %c0_2] : memref<1x2048xf32, #tpu.memory_space<vmem>>, vector<1x2048xf32>
    tpu.vector_store %arg2[%c0_1, %c0_2], %2 {strides = array<i32>} : memref<1x2048xf32, #tpu.memory_space<vmem>>, vector<1x2048xf32>,
    return
  }
  func.func @transform_0(%arg0: i32) -> (i32, i32) {
    %c0_i32 = arith.constant 0 : i32
    %c0_i32_0 = arith.constant 0 : i32
    return %arg0, %c0_i32 : i32, i32
  }
  func.func @transform_1(%arg0: i32) -> (i32, i32) {
    %c0_i32 = arith.constant 0 : i32
    %c0_i32_0 = arith.constant 0 : i32
    return %arg0, %c0_i32 : i32, i32
  }
}

</mosaic_0001>

<bundles_post_ra>
// kernel: tpu_custom_call.1
= control target key start
LH: loop header
LB: loop body
LE: loop exit
PB: predicated region body
PF: predicated region fallthrough
CT: control target
= control target key end

     0   :  { %6 = vsyncpa [#allocation3], 0  ;;  %s430_s0 = inlined_call_operand.hbm [shape: f32[1,2048], index: 0, kind: input, shape index: {}]   ;;  %s431_s1 = inlined_call_operand.hbm [shape: f32[1,2048], index: 1, kind: output, shape index: {}]  }
   0x1   :  { %7 = vsyncpa [#allocation4], 0  ;;  %s326_s6 = smov [#allocation2]  }
   0x2   :  { %s14_s7 = sshll.u32 %s326_s6, 4  ;;  %s15_s7 = int_to_ptr.vmem [resolvable:$true] %s14_s7 }
   0x3   :  { %s290_s8 = scalar_lea.vmem %s15_s7, 256  ;;  %p295_p1 = scmp.lt.s32.totalorder %s15_s7, %s15_s7 }
   0x4   :  { %p291_p0 = scmp.ne.s32.totalorder %s15_s7, %s290_s8  ;;  %p296_p2 = scmp.lt.s32.totalorder %s290_s8, %s290_s8 }
   0x6   :  { %p297_p3 = por %p296_p2, %p295_p1 }
   0x8   :  { %p298_p4 = pnand %p297_p3, %p291_p0 }
   0xa   :  { %301 = shalt.err (!%p298_p4)
}
   0xb   :  { %17 = dma.hbm_to_vmem [thread:$0]  %s430_s0, 256, %s15_s7, [#allocation3]  }
   0xc   :  { %322 = dma.done.wait [#allocation3], 256  }
   0xd   :  { %323 = vsyncadd [#allocation3], 4294967040  ;;  %v347_v0 = vld [vmem:[#allocation2] sm:$0xff]  ;;  %v349_v1 = vld [vmem:[#allocation2 + $0x8] sm:$0xff]  ;;  %v327_v24 = vmov 683565275  }
   0xe   :  { %v23_v2 = vand.u32 2147483647, %v347_v0  ;;  %v26_v3 = vand.u32 2139095040, %v347_v0  ;;  %v127_v4 = vand.u32 2147483647, %v349_v1  ;;  %v130_v5 = vand.u32 2139095040, %v349_v1 }
   0xf   :  { %v328_v26 = vmov 2475754826   ;;  %v329_v28 = vmov 2131351028   ;;  %v330_v30 = vmov 2102212464  }
  0x10   :  { %v27_v6 = vshrl.u32 %v26_v3, 23  ;;  %v30_v7 = vand.u32 8388607, %v23_v2  ;;  %v131_v8 = vshrl.u32 %v130_v5, 23  ;;  %v134_v9 = vand.u32 8388607, %v127_v4 }
  0x11   :  { %v331_v32 = vmov 920167782   ;;  %v332_v40 = vmov 1326507024   ;;  %vm25_vm14 = vcmp.lt.s32.totalorder %v347_v0, 0  ;;  %s333_s0 = smov [#allocation5]  }
  0x12   :  { %v250_v10 = vadd.s32 4294967169, %v27_v6  ;;  %v254_v11 = vadd.s32 4294967169, %v131_v8  ;;  %v31_v13 = vor.u32 8388608, %v30_v7  ;;  %v135_v14 = vor.u32 8388608, %v134_v9  ;;  %s241_s11 = sshll.u32 %s333_s0, 4  ;;  %s242_s11 = int_to_ptr.vmem [resolvable:$true] %s241_s11 }
  0x13   :  { %vm410_vm15 = vcmp.le.f32.partialorder %v23_v2, 0.7853982  ;;  %s302_s12 = scalar_lea.vmem %s242_s11, 256  ;;  %p307_p6 = scmp.lt.s32.totalorder %s242_s11, %s242_s11 }
  0x14   :  { %v33_v12 = vadd.s32 1, %v250_v10  ;;  %v137_v15 = vadd.s32 1, %v254_v11  ;;  %v359_v20 = vshll.u32 %v31_v13, 8  ;;  %v361_v22 = vshll.u32 %v135_v14, 8  ;;  %p303_p5 = scmp.ne.s32.totalorder %s242_s11, %s302_s12  ;;  %p308_p7 = scmp.lt.s32.totalorder %s302_s12, %s302_s12 }
  0x16   :  { %vm34_vm0 = vcmp.gt.s32.totalorder %v33_v12, 0  ;;  %vm138_vm1 = vcmp.gt.s32.totalorder %v137_v15, 0  ;;  %p309_p8 = por %p308_p7, %p307_p6 }
  0x17   :  { %v35_v16 = vsel %vm34_vm0, %v33_v12, 0  ;;  %v139_v19 = vsel %vm138_vm1, %v137_v15, 0  ;;  %vm129_vm0 = vcmp.lt.s32.totalorder %v349_v1, 0  ;;  %vm128_vm1 = vcmp.le.f32.partialorder %v127_v4, 0.7853982 }
  0x18   :  { %v36_v17 = vshrl.u32 %v35_v16, 5  ;;  %v37_v18 = vand.u32 31, %v35_v16  ;;  %v141_v21 = vand.u32 31, %v139_v19  ;;  %v363_v34 = vshrl.u32 %v139_v19, 5  ;;  %p310_p9 = pnand %p309_p8, %p303_p5 }
  0x1a   :  { %v38_v23 = vsub.s32 32, %v37_v18  ;;  %v40_v25 = vshll.u32 %v327_v24, %v37_v18  ;;  %v43_v27 = vshll.u32 %v328_v26, %v37_v18  ;;  %v46_v29 = vshll.u32 %v329_v28, %v37_v18 }
  0x1b   :  { %v49_v31 = vshll.u32 %v330_v30, %v37_v18  ;;  %v52_v33 = vshll.u32 %v331_v32, %v37_v18  ;;  %vm55_vm2 = vcmp.lt.s32.totalorder %v36_v17, 1  ;;  %vm56_vm3 = vcmp.lt.s32.totalorder %v36_v17, 2 }
  0x1c   :  { %v39_v35 = vshrl.u32 %v327_v24, %v38_v23  ;;  %v41_v36 = vshrl.u32 %v328_v26, %v38_v23  ;;  %v44_v37 = vshrl.u32 %v329_v28, %v38_v23  ;;  %v47_v38 = vshrl.u32 %v330_v30, %v38_v23 }
  0x1d   :  { %v50_v39 = vshrl.u32 %v331_v32, %v38_v23  ;;  %v53_v41 = vshrl.u32 %v332_v40, %v38_v23  ;;  %vm58_vm4 = vcmp.lt.s32.totalorder %v36_v17, 4  ;;  %v142_v45 = vsub.s32 32, %v141_v21 }
  0x1e   :  { %v42_v42 = vor.u32 %v41_v36, %v40_v25  ;;  %v45_v43 = vor.u32 %v44_v37, %v43_v27  ;;  %v48_v44 = vor.u32 %v47_v38, %v46_v29  ;;  %vm57_vm5 = vcmp.lt.s32.totalorder %v36_v17, 3 }
  0x1f   :  { %v51_v46 = vor.u32 %v50_v39, %v49_v31  ;;  %v54_v47 = vor.u32 %v53_v41, %v52_v33  ;;  %v144_v48 = vshll.u32 %v327_v24, %v141_v21  ;;  %v147_v56 = vshll.u32 %v328_v26, %v141_v21 }
  0x20   :  { %v59_v49 = vsel %vm55_vm2, %v39_v35, %v42_v42  ;;  %v60_v50 = vsel %vm58_vm4, %v48_v44, 2102212464  ;;  %v63_v51 = vsel %vm55_vm2, %v42_v42, %v45_v43  ;;  %v67_v52 = vsel %vm55_vm2, %v45_v43, %v48_v44 }
  0x21   :  { %v61_v53 = vsel %vm57_vm5, %v45_v43, %v60_v50  ;;  %v64_v54 = vsel %vm58_vm4, %v51_v46, 920167782  ;;  %v68_v55 = vsel %vm58_vm4, %v54_v47, 1326507024  ;;  %v143_v59 = vshrl.u32 %v327_v24, %v142_v45 }
  0x22   :  { %v65_v57 = vsel %vm57_vm5, %v48_v44, %v64_v54  ;;  %v69_v58 = vsel %vm57_vm5, %v51_v46, %v68_v55  ;;  %v145_v60 = vshrl.u32 %v328_v26, %v142_v45  ;;  %v62_v61 = vsel %vm56_vm3, %v59_v49, %v61_v53 }
  0x23   :  { %v66_v62 = vsel %vm56_vm3, %v63_v51, %v65_v57  ;;  %v70_v63 = vsel %vm56_vm3, %v67_v52, %v69_v58  ;;  %v148_v3 = vshrl.u32 %v329_v28, %v142_v45  ;;  %v150_v11 = vshll.u32 %v329_v28, %v141_v21 }
  0x24   :  { %v372_v5 = vmul.u32.u64.low %v359_v20, %v70_v63  ;;  %v373_v6 = vmul.u32.u64.high %v359_v20, %v70_v63, %v372_v5  ;;  %v376_v7 = vmul.u32.u64.low %v359_v20, %v66_v62  ;;  %v377_v8 = vmul.u32.u64.high %v359_v20, %v66_v62, %v376_v7 }
  0x25   :  { %v146_v9 = vor.u32 %v145_v60, %v144_v48  ;;  %v149_v10 = vor.u32 %v148_v3, %v147_v56  ;;  %v151_v12 = vshrl.u32 %v330_v30, %v142_v45  ;;  %v153_v13 = vshll.u32 %v330_v30, %v141_v21 }
  0x26   :  { %v154_v14 = vshrl.u32 %v331_v32, %v142_v45  ;;  %v156_v15 = vshll.u32 %v331_v32, %v141_v21  ;;  %v157_v16 = vshrl.u32 %v332_v40, %v142_v45  ;;  %v78_v17 = vmul.u32 %v359_v20, %v62_v61 }
  0x27   :  { %v152_v18 = vor.u32 %v151_v12, %v150_v11  ;;  %vm159_vm6 = vcmp.lt.s32.totalorder %v363_v34, 1  ;;  %vm160_vm7 = vcmp.lt.s32.totalorder %v363_v34, 2  ;;  %vm80_vm8 = vc.u32 %v373_v6, %v376_v7 }
  0x28   :  { %v81_v19 = vadd.s32 1, %v377_v8  ;;  %v155_v23 = vor.u32 %v154_v14, %v153_v13  ;;  %vm161_vm9 = vcmp.lt.s32.totalorder %v363_v34, 3  ;;  %v158_v24 = vor.u32 %v157_v16, %v156_v15 }
  0x29   :  { %vm162_vm10 = vcmp.lt.s32.totalorder %v363_v34, 4  ;;  %v163_v25 = vsel %vm159_vm6, %v143_v59, %v146_v9  ;;  %v167_v21 = vsel %vm159_vm6, %v146_v9, %v149_v10  ;;  %v171_v28 = vsel %vm159_vm6, %v149_v10, %v152_v18 }
  0x2a   :  { %v82_v26 = vsel %vm80_vm8, %v81_v19, %v377_v8  ;;  %v164_v20 = vsel %vm162_vm10, %v152_v18, 2102212464  ;;  %v168_v27 = vsel %vm162_vm10, %v155_v23, 920167782  ;;  %v172_v32 = vsel %vm162_vm10, %v158_v24, 1326507024 }
  0x2b   :  { %v83_v29 = vadd.s32 %v82_v26, %v78_v17  ;;  %v165_v30 = vsel %vm161_vm9, %v149_v10, %v164_v20  ;;  %v169_v31 = vsel %vm161_vm9, %v152_v18, %v168_v27  ;;  %v173_v36 = vsel %vm161_vm9, %v155_v23, %v172_v32 }
  0x2c   :  { %v166_v33 = vsel %vm160_vm7, %v163_v25, %v165_v30  ;;  %v170_v35 = vsel %vm160_vm7, %v167_v21, %v169_v31  ;;  %v174_v38 = vsel %vm160_vm7, %v171_v28, %v173_v36  ;;  %v79_v57 = vadd.s32 %v376_v7, %v373_v6 }
  0x2d   :  { %v84_v37 = vadd.s32 536870912, %v83_v29  ;;  %v394_v39 = vmul.u32.u64.low %v361_v22, %v170_v35  ;;  %v395_v40 = vmul.u32.u64.high %v361_v22, %v170_v35, %v394_v39  ;;  %v182_v44 = vmul.u32 %v361_v22, %v166_v33 }
  0x2e   :  { %v398_v41 = vmul.u32.u64.low %v361_v22, %v174_v38  ;;  %v399_v42 = vmul.u32.u64.high %v361_v22, %v174_v38, %v398_v41  ;;  %vm115_vm5 = vweird.f32 %v347_v0  ;;  %vm219_vm9 = vweird.f32 %v349_v1 }
  0x2f   :  { %v85_v43 = vshrl.u32 %v84_v37, 30  ;;  %v185_v46 = vadd.s32 1, %v395_v40 }
  0x30   :  { %vm184_vm11 = vc.u32 %v399_v42, %v394_v39  ;;  %v183_v13 = vadd.s32 %v394_v39, %v399_v42 }
  0x31   :  { %v86_v45 = vshll.u32 %v85_v43, 30  ;;  %v186_v34 = vsel %vm184_vm11, %v185_v46, %v395_v40  ;;  %v109_v18 = vsub.s32 4, %v85_v43 }
  0x32   :  { %v187_v48 = vadd.s32 %v186_v34, %v182_v44 }
  0x33   :  { %v87_v47 = vsub.s32 %v83_v29, %v86_v45  ;;  %v110_v27 = vsel %vm25_vm14, %v109_v18, %v85_v43 }
  0x34   :  { %v188_v50 = vadd.s32 536870912, %v187_v48  ;;  %v112_v2 = vsel %vm410_vm15, 0, %v110_v27 }
  0x35   :  { %v89_v49 = vsub.s32 0, %v87_v47  ;;  %v116_v35 = vadd.s32 3, %v112_v2 }
  0x36   :  { %v189_v52 = vshrl.u32 %v188_v50, 30 }
  0x37   :  { %v251_v51 = vmin.u32 %v89_v49, %v87_v47  ;;  %v117_v40 = vand.u32 3, %v116_v35 }
  0x38   :  { %v190_v54 = vshll.u32 %v189_v52, 30  ;;  %v213_v33 = vsub.s32 4, %v189_v52 }
  0x39   :  { %v91_v53 = vclz %v251_v51  ;;  %vm122_vm2 = vcmp.eq.s32.totalorder %v117_v40, 2  ;;  %vm119_vm3 = vcmp.eq.s32.totalorder %v117_v40, 0  ;;  %vm118_vm4 = vcmp.lt.s32.totalorder %v117_v40, 2 }
  0x3a   :  { %v191_v56 = vsub.s32 %v187_v48, %v190_v54  ;;  %v214_v38 = vsel %vm129_vm0, %v213_v33, %v189_v52 }
  0x3b   :  { %v252_v55 = vadd.s32 4294967294, %v91_v53  ;;  %v216_v41 = vsel %vm128_vm1, 0, %v214_v38 }
  0x3c   :  { %v193_v58 = vsub.s32 0, %v191_v56  ;;  %v220_v45 = vadd.s32 3, %v216_v41 }
  0x3d   :  { %vm253_vm12 = vcmp.lt.s32.totalorder %v252_v55, 0 }
  0x3e   :  { %v94_v22 = vsel %vm253_vm12, 0, %v252_v55  ;;  %v255_v62 = vmin.u32 %v193_v58, %v191_v56  ;;  %v221_v48 = vand.u32 3, %v220_v45 }
  0x3f   :  { %v95_v59 = vsub.s32 32, %v94_v22  ;;  %v96_v60 = vshll.u32 %v87_v47, %v94_v22  ;;  %v99_v61 = vsub.s32 4294967266, %v94_v22 }
  0x40   :  { %v195_v5 = vclz %v255_v62  ;;  %vm226_vm6 = vcmp.eq.s32.totalorder %v221_v48, 2  ;;  %vm223_vm7 = vcmp.eq.s32.totalorder %v221_v48, 0  ;;  %vm222_vm8 = vcmp.lt.s32.totalorder %v221_v48, 2 }
  0x41   :  { %v97_v63 = vshrl.u32 %v79_v57, %v95_v59  ;;  %v100_v3 = vadd.s32 127, %v99_v61 }
  0x42   :  { %v256_v10 = vadd.s32 4294967294, %v195_v5 }
  0x43   :  { %v98_v8 = vor.u32 %v97_v63, %v96_v60  ;;  %v101_v9 = vshll.u32 %v100_v3, 23 }
  0x44   :  { %vm257_vm13 = vcmp.lt.s32.totalorder %v256_v10, 0 }
  0x45   :  { %v102_v11 = vor.u32 4788187, %v101_v9  ;;  %v105_v12 = vcvt.s32.f32 %v98_v8  ;;  %v198_v6 = vsel %vm257_vm13, 0, %v256_v10 }
  0x46   :  { %v199_v7 = vsub.s32 32, %v198_v6  ;;  %v200_v15 = vshll.u32 %v191_v56, %v198_v6  ;;  %v203_v16 = vsub.s32 4294967266, %v198_v6 }
  0x47   :  { %v103_v14 = vand.u32 2147483647, %v102_v11 }
  0x48   :  { %v201_v19 = vshrl.u32 %v183_v13, %v199_v7  ;;  %v204_v23 = vadd.s32 127, %v203_v16 }
  0x49   :  { %v106_v17 = vmul.f32 %v105_v12, %v103_v14 }
  0x4a   :  { %v202_v21 = vor.u32 %v201_v19, %v200_v15  ;;  %v205_v26 = vshll.u32 %v204_v23, 23 }
  0x4b   :  { %v107_v25 = vxor.u32 2147483648, %v106_v17 }
  0x4c   :  { %v206_v29 = vor.u32 4788187, %v205_v26  ;;  %v209_v30 = vcvt.s32.f32 %v202_v21 }
  0x4d   :  { %v108_v20 = vsel %vm25_vm14, %v107_v25, %v106_v17 }
  0x4e   :  { %v111_v28 = vsel %vm410_vm15, %v347_v0, %v108_v20  ;;  %v207_v31 = vand.u32 2147483647, %v206_v29 }
  0x4f   :  { %274 = vcosq.f32 %v111_v28 }
  0x50   :  { %276 = vsinq.f32 %v111_v28  ;;  %v210_v32 = vmul.f32 %v209_v30, %v207_v31 }
  0x52   :  { %v211_v36 = vxor.u32 2147483648, %v210_v32 }
  0x54   :  { %v212_v37 = vsel %vm129_vm0, %v211_v36, %v210_v32 }
  0x55   :  { %v215_v39 = vsel %vm128_vm1, %v349_v1, %v212_v37 }
  0x56   :  { %278 = vcosq.f32 %v215_v39 }
  0x57   :  { %280 = vsinq.f32 %v215_v39 }
  0x5c   :  { %v275_v42 = vpop.eup %274 }
  0x5d   :  { %v277_v43 = vpop.eup %276  ;;  %v123_v44 = vxor.u32 2147483648, %v275_v42 }
  0x5e   :  { %v120_v46 = vxor.u32 2147483648, %v277_v43 }
  0x5f   :  { %v124_v4 = vsel %vm122_vm2, %v123_v44, %v277_v43 }
  0x60   :  { %v121_v47 = vsel %vm119_vm3, %v275_v42, %v120_v46 }
  0x61   :  { %v125_v34 = vsel %vm118_vm4, %v121_v47, %v124_v4 }
  0x62   :  { %v126_v49 = vsel %vm115_vm5, nan, %v125_v34 }
  0x63   :  { %v231_v50 = vmul.f32 %v126_v49, %v347_v0  ;;  %v279_v51 = vpop.eup %278 }
  0x64   :  { %v281_v52 = vpop.eup %280  ;;  %v227_v53 = vxor.u32 2147483648, %v279_v51 }
  0x65   :  { %233 = vst [vmem:[#allocation5] sm:$0xff] %v231_v50  ;;  %v224_v54 = vxor.u32 2147483648, %v281_v52 }
  0x66   :  { %v228_v55 = vsel %vm226_vm6, %v227_v53, %v281_v52 }
  0x67   :  { %v225_v56 = vsel %vm223_vm7, %v279_v51, %v224_v54 }
  0x68   :  { %v229_v57 = vsel %vm222_vm8, %v225_v56, %v228_v55 }
  0x69   :  { %v230_v22 = vsel %vm219_vm9, nan, %v229_v57 }
  0x6a   :  { %v232_v58 = vmul.f32 %v230_v22, %v349_v1 }
  0x6c   :  { %234 = vst [vmem:[#allocation5 + $0x8] sm:$0xff] %v232_v58 }
  0x6d   :  { %313 = shalt.err (!%p310_p9)
}
  0x6e   :  { %244 = dma.vmem_to_hbm [thread:$0]  %s242_s11, 256, %s431_s1, [#allocation4]  }
  0x6f   :  { %324 = dma.done.wait [#allocation4], 256  }
  0x70   :  { %325 = vsyncadd [#allocation4], 4294967040 }
  0x71   :  { %248 = vsyncpa [#allocation3], 1 }
  0x72   :  { %249 = vsyncpa [#allocation4], 1 }

</bundles_post_ra>
